<compile_context>
chip_gen: v7x
topology: tpu7x:2x2x1
jax: 0.10.0
libtpu: 0.0.40
codegen_flags: <defaults>
</compile_context>

<pallas_src>
import jax
import jax.numpy as jnp
from jax import lax
from jax.experimental import pallas as pl
from jax.experimental.pallas import tpu as pltpu

INPUT_SIZE = 30
HIDDEN_SIZE = 64
OUTPUT_SIZE = 1
BN_EPS = 1e-5

MAX_TILE_B = 8192              # rows per grid step (multiple of 8)
MEGACORE_SPLIT_MIN = 2048      # split into >=2 tiles above this batch (v7x megacore)
VMEM_LIMIT_BYTES = 48 * 1024 * 1024   # fits v7x's 64 MiB physical VMEM w/ headroom


def _mlp_kernel(x_ref,
                w1_ref, b1_ref,
                w2_ref, b2_ref,
                w3_ref, b3_ref,
                w4t_ref, b4_ref,
                o_ref):
    """One batch tile of the full MLP (BN pre-folded into fc1, dropout = id)."""
    # Cast f32 input tile to bf16 in-kernel (saves a separate XLA HBM pass).
    x_bf = x_ref[...].astype(jnp.bfloat16)

    # fc1 (+ folded bn1) + relu:  (B, 30) @ (30, 64)
    h = jnp.dot(x_bf, w1_ref[...], preferred_element_type=jnp.float32)
    h = jnp.maximum(h + b1_ref[...], 0.0)
    # dropout(p=0.3) == identity in eval mode

    # fc2 + relu:  (B, 64) @ (64, 32)
    h = jnp.dot(h.astype(jnp.bfloat16), w2_ref[...],
                preferred_element_type=jnp.float32)
    h = jnp.maximum(h + b2_ref[...], 0.0)

    # fc3 + relu:  (B, 32) @ (32, 16)
    h = jnp.dot(h.astype(jnp.bfloat16), w3_ref[...],
                preferred_element_type=jnp.float32)
    h = jnp.maximum(h + b3_ref[...], 0.0)

    # fc4 + sigmoid in NT form: (1, 16) x (B, 16)^T -> (1, B)  (lane-dense out)
    o = lax.dot_general(w4t_ref[...], h.astype(jnp.bfloat16),
                        dimension_numbers=(((1,), (1,)), ((), ())),
                        preferred_element_type=jnp.float32)
    o_ref[...] = jax.nn.sigmoid(o + b4_ref[...])


def _round_up(n, m):
    return ((n + m - 1) // m) * m


def _cdiv(a, b):
    return -(-a // b)


def _choose_tiling(batch, max_tile_b):
    """Pick (tile_b, padded_batch, num_tiles); tile_b multiple of 8, no partial blocks."""
    padded8 = _round_up(batch, 8)
    num_tiles = max(1, _cdiv(padded8, max_tile_b))
    if num_tiles == 1 and padded8 > MEGACORE_SPLIT_MIN:
        num_tiles = 2                       # give both v7x TensorCores work
    tile_b = _round_up(_cdiv(padded8, num_tiles), 8)
    return tile_b, tile_b * num_tiles, num_tiles


def neural_net_forward(x, params, *, max_tile_b=MAX_TILE_B):
    """Full MLP forward pass via a batch-tiled Pallas kernel."""
    batch = x.shape[0]
    x = x.astype(jnp.float32)   # no-op for f32 inputs; cast to bf16 happens in-kernel

    # ---- fold BatchNorm1d (eval mode, running stats) into fc1 ---------------
    # Note: fold is done in f32, then cast; if running var were ever tiny, the
    # scale could instead be applied to the f32 accumulator inside the kernel.
    scale = params["gamma"] * jax.lax.rsqrt(params["var"] + BN_EPS)       # (1, 64)
    w1 = (params["w1"] * scale).astype(jnp.bfloat16)                      # (30, 64)
    b1 = (params["b1"] - params["mean"]) * scale + params["beta"]         # (1, 64) f32

    w2 = params["w2"].astype(jnp.bfloat16)                                # (64, 32)
    w3 = params["w3"].astype(jnp.bfloat16)                                # (32, 16)
    w4t = params["w4"].T.astype(jnp.bfloat16)                             # (1, 16)
    b2, b3, b4 = params["b2"], params["b3"], params["b4"]                 # f32

    # ---- batch tiling (pad only the ragged tail so there is no partial block)
    tile_b, padded, num_tiles = _choose_tiling(batch, max_tile_b)
    xp = x if padded == batch else jnp.pad(x, ((0, padded - batch), (0, 0)))
    grid = (num_tiles,)

    def resident(shape):
        # Constant block index -> DMA'd once, stays resident in VMEM.
        return pl.BlockSpec(shape, lambda i, _s=len(shape): (0,) * _s)

    flops = 2 * padded * (INPUT_SIZE * HIDDEN_SIZE
                          + HIDDEN_SIZE * (HIDDEN_SIZE // 2)
                          + (HIDDEN_SIZE // 2) * (HIDDEN_SIZE // 4)
                          + (HIDDEN_SIZE // 4) * OUTPUT_SIZE)
    param_bytes = sum(int(a.size) * a.dtype.itemsize
                      for a in (w1, b1, w2, b2, w3, b3, w4t, b4))
    bytes_accessed = (padded * INPUT_SIZE * 4       # f32 x read
                      + padded * OUTPUT_SIZE * 4    # f32 out write
                      + param_bytes)

    out = pl.pallas_call(
        _mlp_kernel,
        out_shape=jax.ShapeDtypeStruct((num_tiles, 1, tile_b), jnp.float32),
        grid=grid,
        in_specs=[
            pl.BlockSpec((tile_b, INPUT_SIZE), lambda i: (i, 0)),
            resident((INPUT_SIZE, HIDDEN_SIZE)),
            resident((1, HIDDEN_SIZE)),
            resident((HIDDEN_SIZE, HIDDEN_SIZE // 2)),
            resident((1, HIDDEN_SIZE // 2)),
            resident((HIDDEN_SIZE // 2, HIDDEN_SIZE // 4)),
            resident((1, HIDDEN_SIZE // 4)),
            resident((OUTPUT_SIZE, HIDDEN_SIZE // 4)),     # w4t (1, 16)
            resident((1, OUTPUT_SIZE)),                    # b4  (1, 1)
        ],
        # Lane-dense output block: (1, tile_b) per grid step.
        out_specs=pl.BlockSpec((None, 1, tile_b), lambda i: (i, 0, 0)),
        compiler_params=pltpu.CompilerParams(
            dimension_semantics=("parallel",),
            vmem_limit_bytes=VMEM_LIMIT_BYTES,
        ),
        cost_estimate=pl.CostEstimate(
            flops=flops,
            transcendentals=padded,          # one sigmoid per row
            bytes_accessed=bytes_accessed,
        ),
    )(xp, w1, b1, w2, b2, w3, b3, w4t, b4)

    # (num_tiles, 1, tile_b) is contiguous row-major -> free reshape to (padded, 1).
    out = out.reshape(padded, OUTPUT_SIZE)
    return out[:batch] if padded != batch else out


def init_params(key):
    """Deterministic synthetic parameters (matching the PyTorch module shapes)."""
    ks = jax.random.split(key, 12)

    def linear(kw, kb, fan_in, fan_out):
        # PyTorch nn.Linear default init: U(-1/sqrt(fan_in), 1/sqrt(fan_in))
        bound = 1.0 / jnp.sqrt(fan_in)
        w = jax.random.uniform(kw, (fan_in, fan_out), jnp.float32, -bound, bound)
        b = jax.random.uniform(kb, (1, fan_out), jnp.float32, -bound, bound)
        return w, b

    w1, b1 = linear(ks[0], ks[1], INPUT_SIZE, HIDDEN_SIZE)
    w2, b2 = linear(ks[2], ks[3], HIDDEN_SIZE, HIDDEN_SIZE // 2)
    w3, b3 = linear(ks[4], ks[5], HIDDEN_SIZE // 2, HIDDEN_SIZE // 4)
    w4, b4 = linear(ks[6], ks[7], HIDDEN_SIZE // 4, OUTPUT_SIZE)

    gamma = 1.0 + 0.1 * jax.random.normal(ks[8], (1, HIDDEN_SIZE), jnp.float32)
    beta = 0.1 * jax.random.normal(ks[9], (1, HIDDEN_SIZE), jnp.float32)
    mean = 0.1 * jax.random.normal(ks[10], (1, HIDDEN_SIZE), jnp.float32)
    var = 1.0 + 0.1 * jax.random.uniform(ks[11], (1, HIDDEN_SIZE), jnp.float32)

    return {
        "w1": w1, "b1": b1,
        "gamma": gamma, "beta": beta, "mean": mean, "var": var,
        "w2": w2, "b2": b2,
        "w3": w3, "b3": b3,
        "w4": w4, "b4": b4,
    }


def _reference_forward(x, p):
    """Pure-JAX f32 reference matching the PyTorch module in eval mode."""
    h = x @ p["w1"] + p["b1"]
    h = (h - p["mean"]) * jax.lax.rsqrt(p["var"] + BN_EPS) * p["gamma"] + p["beta"]
    h = jnp.maximum(h, 0.0)
    h = jnp.maximum(h @ p["w2"] + p["b2"], 0.0)
    h = jnp.maximum(h @ p["w3"] + p["b3"], 0.0)
    return jax.nn.sigmoid(h @ p["w4"] + p["b4"])


if __name__ == "__main__":
    key = jax.random.PRNGKey(0)
    k_params, k_x = jax.random.split(key)
    params = init_params(k_params)

    # (batch, max_tile_b) pairs: single-tile case and multi-tile + ragged tail.
    checks = [(8, MAX_TILE_B), (300, 128)]
    for batch, mtb in checks:
        kx = jax.random.fold_in(k_x, batch)
        x = jax.random.normal(kx, (batch, INPUT_SIZE), jnp.float32)

        out = neural_net_forward(x, params, max_tile_b=mtb)
        out = jax.block_until_ready(out)
        ref = _reference_forward(x, params)

        assert out.shape == (batch, OUTPUT_SIZE)
        # bf16 matmul inputs with f32 accumulation: compare against the f32
        # reference with a tolerance appropriate for bf16 (outputs in [0, 1]).
        assert jnp.allclose(out, ref, atol=3e-2, rtol=3e-2), (
            f"batch={batch}: max abs err = {jnp.max(jnp.abs(out - ref))}")

    print("KERNEL_OK")
</pallas_src>

<mosaic_0001>
module attributes {stable_mosaic.version = 11 : i64} {
  func.func @_mlp_kernel(%arg0: i32, %arg1: memref<8x30xf32, #tpu.memory_space<vmem>>, %arg2: memref<30x64xbf16, #tpu.memory_space<vmem>>, %arg3: memref<1x64xf32, #tpu.memory_space<vmem>>, %arg4: memref<64x32xbf16, #tpu.memory_space<vmem>>, %arg5: memref<1x32xf32, #tpu.memory_space<vmem>>, %arg6: memref<32x16xbf16, #tpu.memory_space<vmem>>, %arg7: memref<1x16xf32, #tpu.memory_space<vmem>>, %arg8: memref<1x16xbf16, #tpu.memory_space<vmem>>, %arg9: memref<1x1xf32, #tpu.memory_space<vmem>>, %arg10: memref<1x1x8xf32, #tpu.memory_space<vmem>>) attributes {dimension_semantics = [#tpu.dimension_semantics<parallel>], iteration_bounds = array<i64: 1>, scalar_prefetch = 0 : i64, scratch_operands = 0 : i64, tpu.core_type = #tpu.core_type<tc>, window_params = [{transform_indices = @transform_0, window_bounds = array<i64: 8, 30>}, {pipeline_mode = #tpu.pipeline_mode<synchronous>, transform_indices = @transform_1, window_bounds = array<i64: 30, 64>}, {pipeline_mode = #tpu.pipeline_mode<synchronous>, transform_indices = @transform_2, window_bounds = array<i64: 1, 64>}, {pipeline_mode = #tpu.pipeline_mode<synchronous>, transform_indices = @transform_3, window_bounds = array<i64: 64, 32>}, {pipeline_mode = #tpu.pipeline_mode<synchronous>, transform_indices = @transform_4, window_bounds = array<i64: 1, 32>}, {pipeline_mode = #tpu.pipeline_mode<synchronous>, transform_indices = @transform_5, window_bounds = array<i64: 32, 16>}, {pipeline_mode = #tpu.pipeline_mode<synchronous>, transform_indices = @transform_6, window_bounds = array<i64: 1, 16>}, {pipeline_mode = #tpu.pipeline_mode<synchronous>, transform_indices = @transform_7, window_bounds = array<i64: 1, 16>}, {pipeline_mode = #tpu.pipeline_mode<synchronous>, transform_indices = @transform_8, window_bounds = array<i64: 1, 1>}, {transform_indices = @transform_9, window_bounds = array<i64: 1, 1, 8>}]} {
    %c0 = arith.constant 0 : index
    %c0_0 = arith.constant 0 : index
    %0 = vector.load %arg1[%c0, %c0_0] : memref<8x30xf32, #tpu.memory_space<vmem>>, vector<8x30xf32>
    %1 = arith.truncf %0 : vector<8x30xf32> to vector<8x30xbf16>
    %c0_1 = arith.constant 0 : index
    %c0_2 = arith.constant 0 : index
    %2 = vector.load %arg2[%c0_1, %c0_2] : memref<30x64xbf16, #tpu.memory_space<vmem>>, vector<30x64xbf16>
    %cst = arith.constant dense<0.000000e+00> : vector<8x64xf32>
    %3 = tpu.matmul %1, %2, %cst {dimension_numbers = #tpu.dot_dimension_numbers<[1], [0], [0], [1], [0, 0, 1, 1], [], []>} : vector<8x30xbf16>, vector<30x64xbf16>, vector<8x64xf32> -> vector<8x64xf32>
    %c0_3 = arith.constant 0 : index
    %c0_4 = arith.constant 0 : index
    %4 = vector.load %arg3[%c0_3, %c0_4] : memref<1x64xf32, #tpu.memory_space<vmem>>, vector<1x64xf32>
    %5 = vector.broadcast %4 : vector<1x64xf32> to vector<8x64xf32>
    %6 = arith.addf %3, %5 : vector<8x64xf32>
    %cst_5 = arith.constant 0.000000e+00 : f32
    %7 = vector.broadcast %cst_5 : f32 to vector<8x64xf32>
    %8 = arith.maximumf %6, %7 : vector<8x64xf32>
    %9 = arith.truncf %8 : vector<8x64xf32> to vector<8x64xbf16>
    %c0_6 = arith.constant 0 : index
    %c0_7 = arith.constant 0 : index
    %10 = vector.load %arg4[%c0_6, %c0_7] : memref<64x32xbf16, #tpu.memory_space<vmem>>, vector<64x32xbf16>
    %cst_8 = arith.constant dense<0.000000e+00> : vector<8x32xf32>
    %11 = tpu.matmul %9, %10, %cst_8 {dimension_numbers = #tpu.dot_dimension_numbers<[1], [0], [0], [1], [0, 0, 1, 1], [], []>} : vector<8x64xbf16>, vector<64x32xbf16>, vector<8x32xf32> -> vector<8x32xf32>
    %c0_9 = arith.constant 0 : index
    %c0_10 = arith.constant 0 : index
    %12 = vector.load %arg5[%c0_9, %c0_10] : memref<1x32xf32, #tpu.memory_space<vmem>>, vector<1x32xf32>
    %13 = vector.broadcast %12 : vector<1x32xf32> to vector<8x32xf32>
    %14 = arith.addf %11, %13 : vector<8x32xf32>
    %cst_11 = arith.constant 0.000000e+00 : f32
    %15 = vector.broadcast %cst_11 : f32 to vector<8x32xf32>
    %16 = arith.maximumf %14, %15 : vector<8x32xf32>
    %17 = arith.truncf %16 : vector<8x32xf32> to vector<8x32xbf16>
    %c0_12 = arith.constant 0 : index
    %c0_13 = arith.constant 0 : index
    %18 = vector.load %arg6[%c0_12, %c0_13] : memref<32x16xbf16, #tpu.memory_space<vmem>>, vector<32x16xbf16>
    %cst_14 = arith.constant dense<0.000000e+00> : vector<8x16xf32>
    %19 = tpu.matmul %17, %18, %cst_14 {dimension_numbers = #tpu.dot_dimension_numbers<[1], [0], [0], [1], [0, 0, 1, 1], [], []>} : vector<8x32xbf16>, vector<32x16xbf16>, vector<8x16xf32> -> vector<8x16xf32>
    %c0_15 = arith.constant 0 : index
    %c0_16 = arith.constant 0 : index
    %20 = vector.load %arg7[%c0_15, %c0_16] : memref<1x16xf32, #tpu.memory_space<vmem>>, vector<1x16xf32>
    %21 = vector.broadcast %20 : vector<1x16xf32> to vector<8x16xf32>
    %22 = arith.addf %19, %21 : vector<8x16xf32>
    %cst_17 = arith.constant 0.000000e+00 : f32
    %23 = vector.broadcast %cst_17 : f32 to vector<8x16xf32>
    %24 = arith.maximumf %22, %23 : vector<8x16xf32>
    %c0_18 = arith.constant 0 : index
    %c0_19 = arith.constant 0 : index
    %25 = vector.load %arg8[%c0_18, %c0_19] : memref<1x16xbf16, #tpu.memory_space<vmem>>, vector<1x16xbf16>
    %26 = arith.truncf %24 : vector<8x16xf32> to vector<8x16xbf16>
    %cst_20 = arith.constant dense<0.000000e+00> : vector<1x8xf32>
    %27 = tpu.matmul %25, %26, %cst_20 {dimension_numbers = #tpu.dot_dimension_numbers<[1], [1], [0], [0], [0, 0, 1, 0], [], []>} : vector<1x16xbf16>, vector<8x16xbf16>, vector<1x8xf32> -> vector<1x8xf32>
    %c0_21 = arith.constant 0 : index
    %c0_22 = arith.constant 0 : index
    %28 = vector.load %arg9[%c0_21, %c0_22] : memref<1x1xf32, #tpu.memory_space<vmem>>, vector<1x1xf32>
    %29 = vector.broadcast %28 : vector<1x1xf32> to vector<1x8xf32>
    %30 = arith.addf %27, %29 : vector<1x8xf32>
    %31 = arith.negf %30 : vector<1x8xf32>
    %32 = math.exp %31 : vector<1x8xf32>
    %cst_23 = arith.constant 1.000000e+00 : f32
    %33 = vector.broadcast %cst_23 : f32 to vector<1x8xf32>
    %34 = arith.addf %33, %32 : vector<1x8xf32>
    %35 = arith.divf %33, %34 : vector<1x8xf32>
    %c0_24 = arith.constant 0 : index
    %c0_25 = arith.constant 0 : index
    %c0_26 = arith.constant 0 : index
    %36 = vector.load %arg10[%c0_24, %c0_25, %c0_26] : memref<1x1x8xf32, #tpu.memory_space<vmem>>, vector<1x1x8xf32>
    %37 = vector.shape_cast %36 : vector<1x1x8xf32> to vector<1x8xf32>
    %38 = vector.shape_cast %35 : vector<1x8xf32> to vector<1x1x8xf32>
    tpu.vector_store %arg10[%c0_24, %c0_25, %c0_26], %38 {strides = array<i32>} : memref<1x1x8xf32, #tpu.memory_space<vmem>>, vector<1x1x8xf32>,
    return
  }
  func.func @transform_0(%arg0: i32) -> (i32, i32) {
    %c0_i32 = arith.constant 0 : i32
    %c0_i32_0 = arith.constant 0 : i32
    return %arg0, %c0_i32 : i32, i32
  }
  func.func @transform_1(%arg0: i32) -> (i32, i32) {
    %c0_i32 = arith.constant 0 : i32
    %c0_i32_0 = arith.constant 0 : i32
    %c0_i32_1 = arith.constant 0 : i32
    return %c0_i32, %c0_i32_0 : i32, i32
  }
  func.func @transform_2(%arg0: i32) -> (i32, i32) {
    %c0_i32 = arith.constant 0 : i32
    %c0_i32_0 = arith.constant 0 : i32
    %c0_i32_1 = arith.constant 0 : i32
    return %c0_i32, %c0_i32_0 : i32, i32
  }
  func.func @transform_3(%arg0: i32) -> (i32, i32) {
    %c0_i32 = arith.constant 0 : i32
    %c0_i32_0 = arith.constant 0 : i32
    %c0_i32_1 = arith.constant 0 : i32
    return %c0_i32, %c0_i32_0 : i32, i32
  }
  func.func @transform_4(%arg0: i32) -> (i32, i32) {
    %c0_i32 = arith.constant 0 : i32
    %c0_i32_0 = arith.constant 0 : i32
    %c0_i32_1 = arith.constant 0 : i32
    return %c0_i32, %c0_i32_0 : i32, i32
  }
  func.func @transform_5(%arg0: i32) -> (i32, i32) {
    %c0_i32 = arith.constant 0 : i32
    %c0_i32_0 = arith.constant 0 : i32
    %c0_i32_1 = arith.constant 0 : i32
    return %c0_i32, %c0_i32_0 : i32, i32
  }
  func.func @transform_6(%arg0: i32) -> (i32, i32) {
    %c0_i32 = arith.constant 0 : i32
    %c0_i32_0 = arith.constant 0 : i32
    %c0_i32_1 = arith.constant 0 : i32
    return %c0_i32, %c0_i32_0 : i32, i32
  }
  func.func @transform_7(%arg0: i32) -> (i32, i32) {
    %c0_i32 = arith.constant 0 : i32
    %c0_i32_0 = arith.constant 0 : i32
    %c0_i32_1 = arith.constant 0 : i32
    return %c0_i32, %c0_i32_0 : i32, i32
  }
  func.func @transform_8(%arg0: i32) -> (i32, i32) {
    %c0_i32 = arith.constant 0 : i32
    %c0_i32_0 = arith.constant 0 : i32
    %c0_i32_1 = arith.constant 0 : i32
    return %c0_i32, %c0_i32_0 : i32, i32
  }
  func.func @transform_9(%arg0: i32) -> (i32, i32, i32) {
    %c0_i32 = arith.constant 0 : i32
    %c0_i32_0 = arith.constant 0 : i32
    %c0_i32_1 = arith.constant 0 : i32
    return %arg0, %c0_i32, %c0_i32_0 : i32, i32, i32
  }
}

</mosaic_0001>

<bundles_post_ra>
// kernel: tpu_custom_call.1
= control target key start
LH: loop header
LB: loop body
LE: loop exit
PB: predicated region body
PF: predicated region fallthrough
CT: control target
= control target key end

     0   :  { %s560_s0 = inlined_call_operand.vmem [shape: f32[8,30], index: 0, kind: input, shape index: {}]   ;;  %s561_s1 = inlined_call_operand.vmem [shape: bf16[30,64], index: 1, kind: input, shape index: {}]   ;;  %s562_s2 = inlined_call_operand.vmem [shape: f32[1,64], index: 2, kind: input, shape index: {}]   ;;  %s563_s3 = inlined_call_operand.vmem [shape: bf16[64,32], index: 3, kind: input, shape index: {}]   ;;  %s564_s4 = inlined_call_operand.vmem [shape: f32[1,32], index: 4, kind: input, shape index: {}]   ;;  %s565_s5 = inlined_call_operand.vmem [shape: bf16[32,16], index: 5, kind: input, shape index: {}]   ;;  %s566_s6 = inlined_call_operand.vmem [shape: f32[1,16], index: 6, kind: input, shape index: {}]   ;;  %s567_s7 = inlined_call_operand.vmem [shape: bf16[1,16], index: 7, kind: input, shape index: {}]   ;;  %s568_s8 = inlined_call_operand.<no memory space> [shape: f32[1,1], index: 8, kind: input, shape index: {}]   ;;  %s569_s9 = inlined_call_operand.hbm [shape: f32[1,1,8], index: 9, kind: output, shape index: {}]  }
   0x1   :  { %v14_v0 = vstv %s568_s8 }
   0x2   :  { %15 = vst [vmem:[#allocation2] sm:$0x1] %v14_v0 }
   0x3   :  { %v412_v1 = vld [vmem:[%s561_s1] sm:$0xff]   ;;  %v448_v2 = vmov 0.0   ;;  %v413_v3 = vld [vmem:[%s561_s1 + $0x8] sm:$0x7f]   ;;  %vm64_vm0 = vcmask 1046528   ;;  %vm449_vm1 = vmmov 0  }
   0x4   :  { %373 = vmatprep.subr.bf16.mxu0 %v448_v2  ;;  %381 = vmatprep.subr.bf16.mxu1 %v448_v2  ;;  %v36_v4 = vld [vmem:[%s560_s0] sm:$0xff]  ;;  %v66_v5 = vsel %vm64_vm0, %v413_v3, 0  ;;  %vm60_vm2 = vcmask 244736   ;;  %v415_v7 = vld [vmem:[%s563_s3 + $0x8] sm:$0xff]  }
   0x5   :  { %374 = vmatpush3.bf16.msra.mxu0 %v412_v1  ;;  %377 = vmatprep.mubr.msk.bf16.mxu0 %vm449_vm1, %v448_v2  ;;  %v414_v6 = vld [vmem:[%s563_s3] sm:$0xff]   ;;  %v37_v8 = vpack.c.bf16 %v36_v4, %v36_v4 }
   0x6   :  { %375 = vmatprep.subr.bf16.mxu0 %v448_v2  ;;  %389 = vmatprep.mubr.msk.bf16.mxu1 %vm449_vm1, %v448_v2 }
   0x7   :  { %382 = vmatpush3.bf16.msra.mxu1 %v414_v6 }
   0x8   :  { %383 = vmatprep.subr.bf16.mxu1 %v448_v2 }
   0x9   :  { %376 = vmatpush3.bf16.msra.mxu0 %v66_v5 }
   0xa   :  { %393 = vmatprep.subr.bf16.mxu0 %v448_v2 }
   0xb   :  { %16 = vsyncpa [#allocation4], 0  ;;  %384 = vmatpush3.bf16.msra.mxu1 %v415_v7  ;;  %v416_v9 = vld [vmem:[%s563_s3 + $0x10] sm:$0xff]   ;;  %v417_v10 = vld [vmem:[%s563_s3 + $0x18] sm:$0xff]   ;;  %vm149_vm3 = vcmask 523264   ;;  %vm218_vm4 = vcmask 261120   ;;  %v271_v41 = vlaneseq }
   0xc   :  { %378 = vmatmul.mubr.msk.bf16.vlgmr.msra.gmra.mrb[0].mxu0 %vm60_vm2, %v37_v8  ;;  %385 = vmatprep.subr.bf16.mxu1 %v448_v2  ;;  %v344_v11 = vld [vmem:[%s562_s2] ss:$0 sm:$0xff]  ;;  %v419_v20 = vld [vmem:[%s565_s5 + $0x8] sm:$0xff]   ;;  %v450_v30 = vmov 0   ;;  %vm275_vm5 = vcmask 130048   ;;  %vm328_vm6 = vcmask 57344  }
   0xd   :  { %397 = vmatprep.mubr.msk.bf16.mxu0 %vm449_vm1, %v448_v2  ;;  %v418_v19 = vld [vmem:[%s565_s5] sm:$0xff]   ;;  %411 = vset.pattern.permute.xlu0 %v450_v30  ;;  %v272_v42 = vshrl.u32 %v271_v41, 7 }
   0xe   :  { %394 = vmatpush3.bf16.msra.mxu0 %v418_v19  ;;  %v348_v21 = vld [vmem:[%s564_s4] ss:$0 sm:$0xff] }
   0xf   :  { %386 = vmatpush3.bf16.msra.mxu1 %v416_v9  ;;  %395 = vmatprep.subr.bf16.mxu0 %v448_v2  ;;  %v265_v29 = vld [vmem:[#allocation2] sm:$0x1]  ;;  %v273_v43 = vsub.s32 0, %v272_v42 }
  0x10   :  { %387 = vmatprep.subr.bf16.mxu1 %v448_v2  ;;  %268 = vperm.xlu0 %411, %v265_v29   ;;  %v354_v31 = vld [vmem:[%s566_s6] ss:$0 sm:$0xff]  ;;  %s451_s6 = smov [#allocation3]  }
  0x11   :  { %v263_v40 = vld [vmem:[%s567_s7] sm:$0x1]  ;;  %s336_s30 = sshll.u32 %s451_s6, 4  ;;  %s337_s30 = int_to_ptr.vmem [resolvable:$true] %s336_s30 }
  0x12   :  { %396 = vmatpush3.bf16.msra.mxu0 %v419_v20  ;;  %s424_s7 = scalar_lea.vmem %s337_s30, 16  ;;  %s428_s10 = scalar_lea.vmem %s337_s30, 32 }
  0x13   :  { %388 = vmatpush3.bf16.msra.mxu1 %v417_v10  ;;  %401 = vmatprep.subr.bf16.mxu0 %v448_v2  ;;  %p425_p0 = scmp.ne.s32.totalorder %s337_s30, %s424_s7  ;;  %p429_p1 = scmp.lt.s32.totalorder %s337_s30, %s337_s30 }
  0x14   :  { %p430_p2 = scmp.lt.s32.totalorder %s428_s10, %s424_s7 }
  0x16   :  { %p431_p3 = por %p430_p2, %p429_p1 }
  0x18   :  { %p432_p4 = pnand %p431_p3, %p425_p0 }
  0x8f   :  { %v269_v44 = vpop.permute.xlu0 %268 }
  0x90   :  { %v274_v45 = vrot.slane %v269_v44, %v273_v43 }
  0xdf   :  { %v102_v12 = vpop.f32.mrb[0].mxu0 }
  0xe0   :  { %v103_v13 = vadd.f32 %v344_v11, %v102_v12  ;;  %v379_v14 = vpop.f32.mrb[1].mxu0 }
  0xe1   :  { %v105_v15 = vpop.f32.mrb[2].mxu0 }
  0xe2   :  { %v108_v16 = vmax.f32 %v103_v13, 0.0  ;;  %v380_v17 = vpop.f32.mrb[3].mxu0 }
  0xe4   :  { %v109_v18 = vpack.c.bf16 %v108_v16, %v108_v16 }
  0xe6   :  { %390 = vmatmul.mubr.msk.bf16.vlgmr.msra.gmra.mrb[0].mxu1 %vm149_vm3, %v109_v18 }
 0x1b9   :  { %v187_v22 = vpop.f32.mrb[0].mxu1 }
 0x1ba   :  { %v188_v23 = vadd.f32 %v348_v21, %v187_v22  ;;  %v391_v24 = vpop.f32.mrb[1].mxu1 }
 0x1bb   :  { %v190_v25 = vpop.f32.mrb[2].mxu1 }
 0x1bc   :  { %v193_v26 = vmax.f32 %v188_v23, 0.0  ;;  %v392_v27 = vpop.f32.mrb[3].mxu1 }
 0x1be   :  { %v194_v28 = vpack.c.bf16 %v193_v26, %v193_v26 }
 0x1c0   :  { %398 = vmatmul.mubr.msk.bf16.vlgmr.msra.gmra.mrb[4].mxu0 %vm218_vm4, %v194_v28 }
 0x1c1   :  { %403 = vmatprep.mubr.msk.bf16.mxu0 %vm449_vm1, %v448_v2 }
 0x293   :  { %v256_v32 = vpop.f32.mrb[4].mxu0 }
 0x294   :  { %v257_v33 = vadd.f32 %v354_v31, %v256_v32  ;;  %v399_v34 = vpop.f32.mrb[5].mxu0 }
 0x295   :  { %v259_v35 = vpop.f32.mrb[6].mxu0 }
 0x296   :  { %v262_v36 = vmax.f32 %v257_v33, 0.0  ;;  %v400_v37 = vpop.f32.mrb[7].mxu0 }
 0x298   :  { %v264_v38 = vpack.c.bf16 %v262_v36, %v262_v36 }
 0x29a   :  { %v280_v39 = vsel %vm275_vm5, %v264_v38, 0 }
 0x29b   :  { %402 = vmatpush3.bf16.xpose.msra.mxu0 %v280_v39 }
 0x2a2   :  { %404 = vmatmul.mubr.msk.bf16.vlgmr.msra.gmra.mrb[8].mxu0 %vm275_vm5, %v263_v40 }
 0x375   :  { %v316_v46 = vpop.f32.mrb[8].mxu0 }
 0x376   :  { %v317_v47 = vadd.f32 %v316_v46, %v274_v45  ;;  %v405_v48 = vpop.f32.mrb[9].mxu0 }
 0x377   :  { %v319_v49 = vpop.f32.mrb[10].mxu0 }
 0x378   :  { %v359_v50 = vmul.f32 -1.442695, %v317_v47  ;;  %v406_v51 = vpop.f32.mrb[11].mxu0 }
 0x37a   :  { %420 = vpow2.f32 %v359_v50 }
 0x384   :  { %v421_v52 = vpop.eup %420 }
 0x385   :  { %v325_v53 = vadd.f32 1.0, %v421_v52 }
 0x387   :  { %422 = vrcp.f32 %v325_v53 }
 0x391   :  { %v423_v54 = vpop.eup %422 }
 0x392   :  { %329 = vst.msk [vmem:[#allocation3] sm:$0x1] %vm328_vm6, %v423_v54 }
 0x393   :  { %435 = shalt.err (!%p432_p4)
}
 0x394   :  { %s436_s13 = scalar_lea.hbm %s569_s9, 16 }
 0x395   :  { %p437_p5 = scmp.ne.s32.totalorder %s569_s9, %s436_s13  ;;  %p440_p6 = scmp.lt.u32.totalorder %s436_s13, %s569_s9 }
 0x397   :  { %p442_p7 = pnand %p440_p6, %p437_p5 }
 0x399   :  { %445 = shalt.err (!%p442_p7)
}
 0x39a   :  { %339 = dma.vmem_to_hbm [thread:$0]  %s337_s30, 16, %s569_s9, [#allocation4]  }
 0x39b   :  { %446 = dma.done.wait [#allocation4], 16  }
 0x39c   :  { %447 = vsyncadd [#allocation4], 4294967280 }
 0x39d   :  { %343 = vsyncpa [#allocation4], 1 }

</bundles_post_ra>
